<compile_context>
chip_gen: v7x
topology: tpu7x:2x2x1
jax: 0.10.0
libtpu: 0.0.40
codegen_flags: <defaults>
</compile_context>

<pallas_src>
import jax
import jax.numpy as jnp
from jax import lax
from jax.experimental import pallas as pl
from jax.experimental.pallas import tpu as pltpu


def _round_up(a: int, b: int) -> int:
    return (a + b - 1) // b * b


# A @ B^T: contract the last dim of both operands (PyTorch W_in layout).
# TODO(synk): if MLIR/bundle dumps show per-step XLU transposes feeding the
# MXU for this contraction, try a (D, 2H) W_in layout and re-measure.
_CONTRACT_LAST = (((1,), (1,)), ((), ()))
# (M, K) @ (K, N): natural MXU feed for matmul-2 against the transposed W_out.
_CONTRACT_MK_KN = (((1,), (0,)), ((), ()))


def _mlp_kernel(x_ref, w_in_ref, w_out_ref, o_ref, acc_ref):
    # x_ref:     (tm, D)      token tile (resident across the h axis)
    # w_in_ref:  (2, th, D)   merged gate/up rows of W_in for this h tile
    # w_out_ref: (th, D)      W_out^T rows for this h tile
    # o_ref:     (tm, D)      output tile (resident across the h axis)
    # acc_ref:   (tm, D)      f32 accumulator over the h (reduction) axis
    h = pl.program_id(1)

    @pl.when(h == 0)
    def _():
        acc_ref[...] = jnp.zeros_like(acc_ref)

    x = x_ref[...]
    gate = lax.dot_general(x, w_in_ref[0], _CONTRACT_LAST,
                           preferred_element_type=jnp.float32)
    up = lax.dot_general(x, w_in_ref[1], _CONTRACT_LAST,
                         preferred_element_type=jnp.float32)
    act = gate * jax.nn.sigmoid(gate) * up            # SiluAndMul, f32 (tm, th)
    acc_ref[...] += lax.dot_general(act.astype(w_out_ref.dtype),
                                    w_out_ref[...], _CONTRACT_MK_KN,
                                    preferred_element_type=jnp.float32)

    @pl.when(h == pl.num_programs(1) - 1)
    def _():
        o_ref[...] = acc_ref[...].astype(o_ref.dtype)


def prepare_granite_mlp_weights(w_input, w_output):
    """One-time weight prep (do at weight-load time, amortized over calls).

    w_input:  (2*H, D)  MergedColumnParallelLinear weight (PyTorch layout)
    w_output: (D, H)    RowParallelLinear weight (PyTorch layout)
    returns:  (w_in_gu (2, H, D), w_out_t (H, D))
    """
    two_h, d = w_input.shape
    assert two_h % 2 == 0
    h = two_h // 2
    assert w_output.shape == (d, h)
    w_in_gu = w_input.reshape(2, h, d)        # free: contiguous view
    w_out_t = jnp.transpose(w_output)         # (H, D): single one-time HBM pass
    return w_in_gu, w_out_t


def _hw_info():
    """Per-core VMEM capacity + device-kind string (robust to query failure)."""
    vmem_cap = 64 << 20                       # conservative fallback (v7x-sized)
    kind = ""
    try:
        vmem_cap = int(pltpu.get_tpu_info().vmem_capacity_bytes)
    except Exception:
        pass
    try:
        kind = jax.devices()[0].device_kind.lower()
    except Exception:
        pass
    return vmem_cap, kind


def _default_tiles(vmem_cap, kind):
    if vmem_cap <= (64 << 20):    # v7x-class: 2 TC/chip, 64 MiB VMEM per TC
        return 512, 256
    if "v5" in kind:              # v5e: 4x128^2 MXU, most bandwidth-starved
        return 256, 512
    return 512, 512               # v6e and other 128 MiB-VMEM parts


def _th_candidates(H):
    cands = sorted({c for c in range(128, H + 1, 128) if H % c == 0},
                   reverse=True)
    return cands if cands else [H]            # tiny H: full-extent fallback


def granite_moe_shared_mlp(x, w_in_gu, w_out_t, *, tm=None, th=None):
    """Fused shared-expert MLP: (silu(x @ Wg^T) * (x @ Wu^T)) @ Wo^T.

    x:       (T, D)      activations
    w_in_gu: (2, H, D)   prepared input weight (see prepare_granite_mlp_weights)
    w_out_t: (H, D)      prepared (transposed) output weight
    returns: (T, D)
    """
    T, D = x.shape
    two, H, d_in = w_in_gu.shape
    assert two == 2 and d_in == D and w_out_t.shape == (H, D)
    out_dtype = x.dtype

    a_bytes = jnp.dtype(x.dtype).itemsize
    w_bytes = jnp.dtype(w_in_gu.dtype).itemsize

    vmem_cap, kind = _hw_info()
    tm_def, th_def = _default_tiles(vmem_cap, kind)
    tm_req = int(tm) if tm is not None else tm_def
    th_req = int(th) if th is not None else th_def

    # ---- token tiling: packed-sublane multiple for the activation dtype ----
    sub = 32 // a_bytes                       # f32 -> 8, bf16 -> 16, 8-bit -> 32
    tm_req = max(sub, _round_up(tm_req, sub))
    tm_eff = min(tm_req, _round_up(T, sub))   # decode clamps tm to token count

    # ---- intermediate (H) tiling: lane-aligned divisors of H, descending ----
    cands = _th_candidates(H)
    th_list = [c for c in cands if c <= th_req] or [cands[-1]]

    # ---- honest VMEM working-set model + auto-fit against real capacity ----
    def working_bytes(tm_, th_):
        return (2 * tm_ * D * a_bytes            # x tiles (double-buffered)
                + 2 * tm_ * D * a_bytes          # output tiles
                + 2 * 2 * th_ * D * w_bytes      # merged gate+up tiles
                + 2 * th_ * D * w_bytes          # W_out^T tiles
                + tm_ * D * 4                    # f32 accumulator scratch
                + 3 * tm_ * th_ * 4)             # f32 gate/up/act intermediates

    budget = int(vmem_cap * 0.80)
    ti = 0
    while working_bytes(tm_eff, th_list[ti]) > budget:
        if ti + 1 < len(th_list):
            ti += 1                              # shrink th first (keeps tm big)
        elif tm_eff > 2 * sub:
            tm_eff = _round_up(tm_eff // 2, sub)
        else:
            break
    th_eff = th_list[ti]
    n_h = H // th_eff if H % th_eff == 0 else 1  # th_eff == H fallback

    Tp = _round_up(T, tm_eff)
    if Tp != T:
        x = jnp.pad(x, ((0, Tp - T), (0, 0)))
    n_m = Tp // tm_eff
    grid = (n_m, n_h)

    working = working_bytes(tm_eff, th_eff)
    vmem_limit = int(min(max(working * 3 // 2 + (8 << 20), 32 << 20),
                         int(vmem_cap * 0.90)))

    # ---- advisory cost estimate (weights re-streamed once per token tile) ----
    flops = 6 * Tp * D * H                       # 2*T*D*2H (mm1) + 2*T*H*D (mm2)
    transcendentals = Tp * H                     # sigmoid
    bytes_accessed = (Tp * D * a_bytes           # x read
                      + Tp * D * a_bytes         # output write
                      + n_m * (2 * H * D + H * D) * w_bytes)   # W_in + W_out

    out = pl.pallas_call(
        _mlp_kernel,
        out_shape=jax.ShapeDtypeStruct((Tp, D), out_dtype),
        grid_spec=pltpu.PrefetchScalarGridSpec(
            num_scalar_prefetch=0,
            grid=grid,
            in_specs=[
                pl.BlockSpec((tm_eff, D), lambda i, h: (i, 0)),       # x tile
                pl.BlockSpec((2, th_eff, D), lambda i, h: (0, h, 0)), # gate+up
                pl.BlockSpec((th_eff, D), lambda i, h: (h, 0)),       # W_out^T
            ],
            out_specs=pl.BlockSpec((tm_eff, D), lambda i, h: (i, 0)),
            scratch_shapes=[pltpu.VMEM((tm_eff, D), jnp.float32)],
        ),
        compiler_params=pltpu.CompilerParams(
            dimension_semantics=("parallel", "arbitrary"),
            vmem_limit_bytes=vmem_limit),
        cost_estimate=pl.CostEstimate(
            flops=flops,
            transcendentals=transcendentals,
            bytes_accessed=bytes_accessed),
    )(x, w_in_gu, w_out_t)

    return out[:T] if Tp != T else out


def _reference(x, w_input, w_output):
    gu = jnp.dot(x, w_input.T, precision=jax.lax.Precision.HIGHEST)
    h = gu.shape[-1] // 2
    act = jax.nn.silu(gu[:, :h]) * gu[:, h:]
    return jnp.dot(act, w_output.T, precision=jax.lax.Precision.HIGHEST)


if __name__ == "__main__":
    # Small config: hidden_size=128, shared_intermediate_size=256, 20 tokens.
    # T=20 exercises the ragged-token padding path; th=128 forces 2 reduction
    # steps over H (exercises the accumulator + merged gate/up block indexing).
    T, D, H = 20, 128, 256
    key = jax.random.PRNGKey(0)
    k_x, k_wi, k_wo = jax.random.split(key, 3)

    x = jax.random.normal(k_x, (T, D), dtype=jnp.float32)
    # PyTorch-style weight shapes: (out_features, in_features)
    w_input = jax.random.normal(k_wi, (2 * H, D), dtype=jnp.float32) * 0.02
    w_output = jax.random.normal(k_wo, (D, H), dtype=jnp.float32) * 0.02
    # NOTE: production should hold weights/activations in bf16 (fp8 on v7x);
    # f32 here keeps the small correctness test tight.

    # One-time weight prep (amortized over all forward calls).
    w_in_gu, w_out_t = prepare_granite_mlp_weights(w_input, w_output)

    out = granite_moe_shared_mlp(x, w_in_gu, w_out_t, th=128)
    out = jax.block_until_ready(out)

    ref = _reference(x, w_input, w_output)
    assert out.shape == (T, D)
    max_err = jnp.max(jnp.abs(out - ref))
    assert jnp.allclose(out, ref, atol=1e-3, rtol=1e-3), \
        f"mismatch vs reference (max abs err {max_err})"

    print("KERNEL_OK")
</pallas_src>

<mosaic_0001>
module attributes {stable_mosaic.version = 11 : i64} {
  func.func @_mlp_kernel(%arg0: i32, %arg1: i32, %arg2: memref<24x128xf32, #tpu.memory_space<vmem>>, %arg3: memref<2x128x128xf32, #tpu.memory_space<vmem>>, %arg4: memref<128x128xf32, #tpu.memory_space<vmem>>, %arg5: memref<24x128xf32, #tpu.memory_space<vmem>>, %arg6: memref<24x128xf32, #tpu.memory_space<vmem>>) attributes {dimension_semantics = [#tpu.dimension_semantics<parallel>, #tpu.dimension_semantics<arbitrary>], iteration_bounds = array<i64: 1, 2>, scalar_prefetch = 0 : i64, scratch_operands = 1 : i64, tpu.core_type = #tpu.core_type<tc>, window_params = [{transform_indices = @transform_0, window_bounds = array<i64: 24, 128>}, {transform_indices = @transform_1, window_bounds = array<i64: 2, 128, 128>}, {transform_indices = @transform_2, window_bounds = array<i64: 128, 128>}, {transform_indices = @transform_3, window_bounds = array<i64: 24, 128>}]} {
    %c0_i32 = arith.constant 0 : i32
    %0 = arith.cmpi eq, %arg1, %c0_i32 : i32
    %1 = arith.extui %0 : i1 to i32
    %c0_i32_0 = arith.constant 0 : i32
    %2 = arith.cmpi ne, %1, %c0_i32_0 : i32
    scf.if %2 {
      %cst_17 = arith.constant 0.000000e+00 : f32
      %25 = vector.broadcast %cst_17 : f32 to vector<24x128xf32>
      %c0_18 = arith.constant 0 : index
      %c0_19 = arith.constant 0 : index
      %26 = vector.load %arg6[%c0_18, %c0_19] : memref<24x128xf32, #tpu.memory_space<vmem>>, vector<24x128xf32>
      tpu.vector_store %arg6[%c0_18, %c0_19], %25 {strides = array<i32>} : memref<24x128xf32, #tpu.memory_space<vmem>>, vector<24x128xf32>,
    } else {
    }
    %c0 = arith.constant 0 : index
    %c0_1 = arith.constant 0 : index
    %3 = vector.load %arg2[%c0, %c0_1] : memref<24x128xf32, #tpu.memory_space<vmem>>, vector<24x128xf32>
    %c0_2 = arith.constant 0 : index
    %c0_3 = arith.constant 0 : index
    %c0_4 = arith.constant 0 : index
    %4 = vector.load %arg3[%c0_2, %c0_3, %c0_4] : memref<2x128x128xf32, #tpu.memory_space<vmem>>, vector<1x128x128xf32>
    %5 = vector.shape_cast %4 : vector<1x128x128xf32> to vector<128x128xf32>
    %cst = arith.constant dense<0.000000e+00> : vector<24x128xf32>
    %6 = tpu.matmul %3, %5, %cst {dimension_numbers = #tpu.dot_dimension_numbers<[1], [1], [0], [0], [0, 0, 1, 0], [], []>} : vector<24x128xf32>, vector<128x128xf32>, vector<24x128xf32> -> vector<24x128xf32>
    %c1 = arith.constant 1 : index
    %c0_5 = arith.constant 0 : index
    %c0_6 = arith.constant 0 : index
    %7 = vector.load %arg3[%c1, %c0_5, %c0_6] : memref<2x128x128xf32, #tpu.memory_space<vmem>>, vector<1x128x128xf32>
    %8 = vector.shape_cast %7 : vector<1x128x128xf32> to vector<128x128xf32>
    %cst_7 = arith.constant dense<0.000000e+00> : vector<24x128xf32>
    %9 = tpu.matmul %3, %8, %cst_7 {dimension_numbers = #tpu.dot_dimension_numbers<[1], [1], [0], [0], [0, 0, 1, 0], [], []>} : vector<24x128xf32>, vector<128x128xf32>, vector<24x128xf32> -> vector<24x128xf32>
    %10 = arith.negf %6 : vector<24x128xf32>
    %11 = math.exp %10 : vector<24x128xf32>
    %cst_8 = arith.constant 1.000000e+00 : f32
    %12 = vector.broadcast %cst_8 : f32 to vector<24x128xf32>
    %13 = arith.addf %12, %11 : vector<24x128xf32>
    %14 = arith.divf %12, %13 : vector<24x128xf32>
    %15 = arith.mulf %6, %14 : vector<24x128xf32>
    %16 = arith.mulf %15, %9 : vector<24x128xf32>
    %c0_9 = arith.constant 0 : index
    %c0_10 = arith.constant 0 : index
    %17 = vector.load %arg6[%c0_9, %c0_10] : memref<24x128xf32, #tpu.memory_space<vmem>>, vector<24x128xf32>
    %c0_11 = arith.constant 0 : index
    %c0_12 = arith.constant 0 : index
    %18 = vector.load %arg4[%c0_11, %c0_12] : memref<128x128xf32, #tpu.memory_space<vmem>>, vector<128x128xf32>
    %cst_13 = arith.constant dense<0.000000e+00> : vector<24x128xf32>
    %19 = tpu.matmul %16, %18, %cst_13 {dimension_numbers = #tpu.dot_dimension_numbers<[1], [0], [0], [1], [0, 0, 1, 1], [], []>} : vector<24x128xf32>, vector<128x128xf32>, vector<24x128xf32> -> vector<24x128xf32>
    %20 = arith.addf %17, %19 : vector<24x128xf32>
    %c0_14 = arith.constant 0 : index
    %c0_15 = arith.constant 0 : index
    %21 = vector.load %arg6[%c0_14, %c0_15] : memref<24x128xf32, #tpu.memory_space<vmem>>, vector<24x128xf32>
    tpu.vector_store %arg6[%c0_14, %c0_15], %20 {strides = array<i32>} : memref<24x128xf32, #tpu.memory_space<vmem>>, vector<24x128xf32>,
    %c1_i32 = arith.constant 1 : i32
    %22 = arith.cmpi eq, %arg1, %c1_i32 : i32
    %23 = arith.extui %22 : i1 to i32
    %c0_i32_16 = arith.constant 0 : i32
    %24 = arith.cmpi ne, %23, %c0_i32_16 : i32
    scf.if %24 {
      %c0_17 = arith.constant 0 : index
      %c0_18 = arith.constant 0 : index
      %25 = vector.load %arg6[%c0_17, %c0_18] : memref<24x128xf32, #tpu.memory_space<vmem>>, vector<24x128xf32>
      %c0_19 = arith.constant 0 : index
      %c0_20 = arith.constant 0 : index
      %26 = vector.load %arg5[%c0_19, %c0_20] : memref<24x128xf32, #tpu.memory_space<vmem>>, vector<24x128xf32>
      tpu.vector_store %arg5[%c0_19, %c0_20], %25 {strides = array<i32>} : memref<24x128xf32, #tpu.memory_space<vmem>>, vector<24x128xf32>,
    } else {
    }
    return
  }
  func.func @transform_0(%arg0: i32, %arg1: i32) -> (i32, i32) {
    %c0_i32 = arith.constant 0 : i32
    %c0_i32_0 = arith.constant 0 : i32
    return %arg0, %c0_i32 : i32, i32
  }
  func.func @transform_1(%arg0: i32, %arg1: i32) -> (i32, i32, i32) {
    %c0_i32 = arith.constant 0 : i32
    %c0_i32_0 = arith.constant 0 : i32
    %c0_i32_1 = arith.constant 0 : i32
    return %c0_i32, %arg1, %c0_i32_0 : i32, i32, i32
  }
  func.func @transform_2(%arg0: i32, %arg1: i32) -> (i32, i32) {
    %c0_i32 = arith.constant 0 : i32
    %c0_i32_0 = arith.constant 0 : i32
    return %arg1, %c0_i32 : i32, i32
  }
  func.func @transform_3(%arg0: i32, %arg1: i32) -> (i32, i32) {
    %c0_i32 = arith.constant 0 : i32
    %c0_i32_0 = arith.constant 0 : i32
    return %arg0, %c0_i32 : i32, i32
  }
}

</mosaic_0001>

<bundles_post_ra>
// kernel: tpu_custom_call.1
= control target key start
LH: loop header
LB: loop body
LE: loop exit
PB: predicated region body
PF: predicated region fallthrough
CT: control target
= control target key end

     0   :  { %8 = vsyncpa [#allocation4], 0  ;;  %s1626_s0 = inlined_call_operand.hbm [shape: f32[24,128], index: 0, kind: input, shape index: {}]   ;;  %s1627_s1 = inlined_call_operand.hbm [shape: f32[2,256,128], index: 1, kind: input, shape index: {}]   ;;  %s1628_s2 = inlined_call_operand.hbm [shape: f32[256,128], index: 2, kind: input, shape index: {}]   ;;  %s1629_s3 = inlined_call_operand.hbm [shape: f32[24,128], index: 3, kind: output, shape index: {}]  }
   0x1   :  { %9 = vsyncpa [#allocation7], 0 }
   0x2   :  { %11 = vsyncpa [#allocation7 + $0x1], 0 }
   0x3   :  { %12 = vsyncpa [#allocation5], 0  ;;  %s1329_s12 = smov 0   ;;  %s1331_s13 = smov 0  }
   0x4   :  { %s1333_s14 = smov 0   ;;  %s1335_s15 = smov 0  }
   0x5   :  { %s1337_s16 = smov 0   ;;  %s1339_s17 = smov 0  }
   0x6 LB: > { %s1358_s18 = sadd.s32 4294967295, %s1288_s17   ;;  %s27_s19 = sadd.s32 1, %s1284_s16  ;;  %s1288_s17 = sphi %s1339_s17, %s18_s17   ;;  %s1284_s16 = sphi %s1337_s16, %s1647_s16   ;;  %s1280_s15 = sphi %s1335_s15, %s1646_s15   ;;  %s1276_s14 = sphi %s1333_s14, %s1645_s14   ;;  %s1272_s13 = sphi %s1331_s13, %s1644_s13   ;;  %s1268_s12 = sphi %s1329_s12, %s1643_s12  }
   0x7   : > { %p28_p0 = scmp.ge.s32.totalorder %s27_s19, 2  ;;  %s63_s20 = sadd.s32 1, %s1276_s14 }
   0x8   : > { %p70_p1 = scmp.ne.s32.totalorder %s1276_s14, %s1272_s13  ;;  %p71_p2 = scmp.eq.s32.totalorder %s1288_s17, 0 }
   0x9   : > { %s1649_s19 = smov (%p28_p0, %s27_s19), 0  ;;  %p76_p4 = scmp.ne.s32.totalorder %s1272_s13, %s1268_s12 }
   0xa   : > { %p1367_p3 = por %p71_p2, %p70_p1  ;;  %s60_s22 = ssub.s32 %s1284_s16, %s1649_s19 }
   0xb   : > { %p1630_p5 = scmp.eq.s32.totalorder %s1358_s18, 0  ;;  %p61_p6 = scmp.eq.s32.totalorder %s60_s22, 0 }
   0xc   : > { %s1634_s21 = scalar_select %p1367_p3, 1, 0 }
   0xd   : > { %p733_p7 = scmp.ge.s32.totalorder %s1288_s17, 1  ;;  %p1378_p8 = por %p1630_p5, %p76_p4 }
   0xe   : > { %p139_p9 = scmp.lt.s32.totalorder %s1288_s17, 3  ;;  %s1290_s26 = smov [#allocation3]  }
   0xf   : > { %s1635_s23 = scalar_select %p1378_p8, 1, 0 }
  0x10   : > { %s1384_s24 = scalar_select %p61_p6, %s1276_s14, %s63_s20  }
  0x11   : > { %p1386_p10 = pnand %p733_p7, %p139_p9  ;;  %s154_s27 = sshll.u32 %s1290_s26, 4  ;;  %s155_s27 = int_to_ptr.vmem [resolvable:$true] %s154_s27 }
  0x12   : > { %s1148_s4 = scalar_lea.hbm %s1626_s0, 384 }
  0x13   : > { %s1636_s25 = scalar_select %p1386_p10, 1, 0 }
  0x14   : > { %p1062_p11 = pneg %p1386_p10  ;;  %p1149_p13 = scmp.ne.s32.totalorder %s1626_s0, %s1148_s4 }
  0x15   : > { %p1155_p4 = scmp.lt.u32.totalorder %s1148_s4, %s1626_s0 }
  0x16   : > { %p1394_p12 = pnand %p1062_p11, %p1630_p5 }
  0x18   : > { %p1150_p0 = pneg %p1394_p12 }
  0x1a   : > { %p1151_p1 = pnand %p1150_p0, %p1149_p13 }
  0x1c   : > { %p1152_p2 = pneg %p1151_p1 }
  0x1e   : > { %p1157_p6 = pnand %p1155_p4, %p1152_p2 }
  0x20   : > { %1160 = shalt.err (!%p1157_p6)
}
  0x21   : > { %s1161_s9 = scalar_lea.vmem %s155_s27, 384  ;;  %p1169_p5 = scmp.lt.s32.totalorder %s155_s27, %s155_s27 }
  0x22   : > { %p1162_p7 = scmp.ne.s32.totalorder %s155_s27, %s1161_s9  ;;  %p1170_p8 = scmp.lt.s32.totalorder %s1161_s9, %s1161_s9 }
  0x24   : > { %p1164_p9 = pnand %p1162_p7, %p1150_p0  ;;  %p1171_p10 = por %p1170_p8, %p1169_p5 }
  0x26   : > { %p1165_p11 = pneg %p1164_p9 }
  0x28   : > { %p1172_p3 = pnand %p1171_p10, %p1165_p11 }
  0x2a   : > { %1175 = shalt.err (!%p1172_p3)
}
  0x2b   : > { %s1291_s10 = smov 128   ;;  %s1292_s11 = smov 8  }
  0x2c   : > { %1065 = dma.hbm_to_vmem [thread:$0]  (!%p1394_p12), %s1626_s0, 384, %s155_s27, [#allocation4], %s1291_s10, %s1291_s10, %s1292_s11  }
  0x2d   : > { %p735_p13 = scmp.ge.s32.totalorder %s1288_s17, 2 }
  0x2f   : > { %164 = sbr.rel (%p735_p13) target bundleno = 93 (0x5d), region = 20 }
  0x36   : > { %s168_s22 = sand.u32 1, %s1288_s17   ;;  %s170_s26 = sand.u32 1, %s1276_s14  }
  0x37   : > { %s736_s29 = sshll.u32 %s170_s26, 8  ;;  %s773_s28 = sshll.u32 %s1284_s16, 11 }
  0x38   : > { %s178_s27 = scalar_lea.hbm %s1627_s1, %s773_s28  ;;  %p1638_p3 = scmp.ne.s32.totalorder %s1634_s21, 0 }
  0x39   : > { %s172_s6 = scalar_lea.vmem [#allocation6], %s736_s29  ;;  %s1293_s9 = smov 4096  }
  0x3a   : > { %s1045_s5 = scalar_select %p1638_p3, [#allocation0], [#allocation12] }
  0x3b   : > { %s191_s7 = sshll.u32 %s172_s6, 4  ;;  %1046 = sst [smem:[#allocation11]] (%p1638_p3), %s1293_s9  ;;  %s192_s7 = int_to_ptr.vmem [resolvable:$true] %s191_s7 }
  0x3c   : > { %s183_s8 = sld [smem:[%s1045_s5]]   ;;  %s1294_s10 = smov 2048  }
  0x3d   : > { %1047 = sst [smem:[#allocation11 + $0x1]] (%p1638_p3), %s1294_s10  ;;  %s1295_s11 = smov 16  }
  0x3e   : > { %1048 = sst [smem:[#allocation11 + $0x2]] (%p1638_p3), %s1295_s11  ;;  %s1296_s12 = smov 128  }
  0x3f   : > { %1049 = sst [smem:[#allocation11 + $0x3]] (%p1638_p3), %s1296_s12  ;;  %s1297_s29 = smov 8  }
  0x40   : > { %1050 = sst [smem:[#allocation11 + $0x4]] (%p1638_p3), %s1296_s12  ;;  %s1435_s4 = scalar_lea.sflag [#allocation7], %s168_s22 }
  0x41   : > { %1051 = sst [smem:[#allocation11 + $0x5]] (%p1638_p3), %s1297_s29  ;;  %s1298_s5 = smov [#allocation10]  }
  0x42   : > { %s739_s20 = sshll.u32 %s183_s8, 26  ;;  %s741_s6 = sshll.u32 %s170_s26, 7 }
  0x43   : > { %s740_s30 = sadd.s32 134217728, %s739_s20  ;;  %s1443_s11 = scalar_lea.hbm %s1628_s2, %s773_s28 }
  0x44   : > { %1052 = dma.general (%p1638_p3), %s178_s27, 4096, %s192_s7, %s1435_s4, %s1298_s5, [#allocation11], %s740_s30, 0  }
  0x45   : > { %s218_s8 = scalar_lea.vmem [#allocation8], %s741_s6  ;;  %s1176_s22 = scalar_lea.hbm %s1443_s11, 2048 }
  0x46   : > { %s225_s12 = sshll.u32 %s218_s8, 4  ;;  %p1177_p5 = scmp.ne.s32.totalorder %s1443_s11, %s1176_s22  ;;  %s1445_s12 = int_to_ptr.vmem [resolvable:$true] %s225_s12 }
  0x47   : > { %s1180_s7 = scalar_lea.hbm %s1628_s2, 4096  ;;  %p1181_p12 = scmp.lt.u32.totalorder %s1443_s11, %s1628_s2 }
  0x48   : > { %p1178_p8 = pnand %p1177_p5, %p1638_p3  ;;  %p1182_p0 = scmp.lt.u32.totalorder %s1180_s7, %s1176_s22 }
  0x49   : > { %p1184_p2 = scmp.lt.u32.totalorder %s1176_s22, %s1443_s11 }
  0x4a   : > { %p1179_p10 = pneg %p1178_p8  ;;  %p1183_p1 = por %p1182_p0, %p1181_p12 }
  0x4c   : > { %p1185_p4 = por %p1184_p2, %p1183_p1 }
  0x4e   : > { %p1186_p6 = pnand %p1185_p4, %p1179_p10 }
  0x50   : > { %1189 = shalt.err (!%p1186_p6)
}
  0x51   : > { %s1190_s29 = scalar_lea.vmem %s1445_s12, 2048  ;;  %s1299_s30 = smov [#allocation8]  }
  0x52   : > { %p1191_p7 = scmp.ne.s32.totalorder %s1445_s12, %s1190_s29  ;;  %s1194_s5 = sshll.u32 %s1299_s30, 4  ;;  %s1195_s5 = int_to_ptr.vmem [resolvable:$false] %s1194_s5 }
  0x53   : > { %s1196_s6 = scalar_lea.vmem %s1195_s5, 4096  ;;  %p1197_p13 = scmp.lt.s32.totalorder %s1445_s12, %s1195_s5 }
  0x54   : > { %p1192_p9 = pnand %p1191_p7, %p1638_p3  ;;  %p1198_p5 = scmp.lt.s32.totalorder %s1196_s6, %s1190_s29 }
  0x56   : > { %p1193_p11 = pneg %p1192_p9  ;;  %p1199_p8 = por %p1198_p5, %p1197_p13 }
  0x58   : > { %p1200_p12 = pnand %p1199_p8, %p1193_p11 }
  0x5a   : > { %1203 = shalt.err (!%p1200_p12)
}
  0x5b   : > { %s1300_s9 = smov 128   ;;  %s1301_s10 = smov 8  }
  0x5c   : > { %1053 = dma.hbm_to_vmem [thread:$0]  (%p1638_p3), %s1443_s11, 2048, %s1445_s12, %s1435_s4, %s1300_s9, %s1300_s9, %s1301_s10  }
  0x5d PF: > { %p1639_p10 = scmp.ne.s32.totalorder %s1636_s25, 0 }
  0x5e   : > { %p1640_p0 = scmp.eq.s32.totalorder (!%p1639_p10), %s1358_s18, 0 }
  0x5f   : > { %237 = sbr.rel (%p1639_p10) target bundleno = 682 (0x2aa), region = 32 }
  0x66   : > { %1255 = dma.done.wait (%p1640_p0), [#allocation4], 384   ;;  %p1641_p1 = pmov %p1640_p0 }
  0x67   : > { %s243_s8 = sand.u32 1, %s1358_s18   ;;  %s245_s22 = sand.u32 1, %s1272_s13  }
  0x68   : > { %1257 = vsyncadd (%p1641_p1), [#allocation4], 4294966912  ;;  %s746_s26 = sshll.u32 %s245_s22, 8  ;;  %s244_s27 = scalar_lea.sflag [#allocation7], %s243_s8 }
  0x69   : > { %s1477_s7 = scalar_lea.vmem [#allocation6], %s746_s26  ;;  %p1642_p3 = scmp.ne.s32.totalorder %s1635_s23, 0 }
  0x6b   : > { %1259 = dma.done.wait (%p1642_p3), %s244_s27, 6144  }
  0x6c   : > { %1261 = vsyncadd (%p1642_p3), %s244_s27, 4294961152  ;;  %s747_s21 = sshll.u32 %s245_s22, 7  ;;  %p748_p2 = scmp.ne.s32.totalorder %s1280_s15, 0 }
  0x6d   : > { %s1483_s25 = scalar_lea.vmem [#allocation8], %s747_s21  ;;  %v1302_v0 = vmov (!%p748_p2), 0.0  }
  0x6e   : > { %286 = sbr.rel (%p748_p2) target bundleno = 117 (0x75), region = 48  ;;  %287 = vst [vmem:[#allocation2] sm:$0xff] (!%p748_p2), %v1302_v0  ;;  %288 = vst [vmem:[#allocation2 + $0x8] sm:$0xff] (!%p748_p2), %v1302_v0 }
  0x6f   : > { %289 = vst [vmem:[#allocation2 + $0x10] sm:$0xff] (!%p748_p2), %v1302_v0 }
  0x75 PF: > { %v293_v1 = vld [vmem:[%s1477_s7] sm:$0xff]  ;;  %v294_v2 = vld [vmem:[%s1477_s7 + $0x8] sm:$0xff]  ;;  %v1303_v3 = vmov 0.0|0.0   ;;  %vm1304_vm0 = vmmov 0   ;;  %v1305_v6 = vmov 0.0   ;;  %v295_v8 = vld [vmem:[%s1477_s7 + $0x10] sm:$0xff] }
  0x76   : > { %955 = vmatprep.subr.bf16.mxu0 %v1303_v3  ;;  %v956_v4 = vpack.c.bf16 %v294_v2, %v293_v1  ;;  %979 = vmatprep.subr.bf16.mxu1 %v1303_v3  ;;  %v749_v5 = vld [vmem:[%s1477_s7 + $0x80] sm:$0xff]  ;;  %v750_v7 = vld [vmem:[%s1477_s7 + $0x88] sm:$0xff]  ;;  %v296_v9 = vld [vmem:[%s1477_s7 + $0x18] sm:$0xff]  ;;  %p768_p4 = scmp.ne.s32.totalorder %s1280_s15, 1 }
  0x77   : > { %864 = vmatprep.mubr.msk.f32.mxu0 %vm1304_vm0, %v1305_v6  ;;  %905 = vmatprep.mubr.msk.f32.mxu1 %vm1304_vm0, %v1305_v6  ;;  %v980_v10 = vpack.c.bf16 %v750_v7, %v749_v5  ;;  %v959_v11 = vpack.c.bf16 %v296_v9, %v295_v8  ;;  %v751_v12 = vld [vmem:[%s1477_s7 + $0x90] sm:$0xff]  ;;  %v752_v13 = vld [vmem:[%s1477_s7 + $0x98] sm:$0xff]  ;;  %v297_v15 = vld [vmem:[%s1477_s7 + $0x20] sm:$0xff] }
  0x78   : > { %957 = vmatpush3.bf16.xpose.msra.mxu0 %v956_v4  ;;  %v983_v14 = vpack.c.bf16 %v752_v13, %v751_v12  ;;  %v298_v16 = vld [vmem:[%s1477_s7 + $0x28] sm:$0xff]  ;;  %v753_v18 = vld [vmem:[%s1477_s7 + $0xa0] sm:$0xff]  ;;  %v299_v21 = vld [vmem:[%s1477_s7 + $0x30] sm:$0xff] }
  0x79   : > { %958 = vmatprep.subr.bf16.mxu0 %v1303_v3  ;;  %981 = vmatpush3.bf16.xpose.msra.mxu1 %v980_v10  ;;  %v962_v17 = vpack.c.bf16 %v298_v16, %v297_v15  ;;  %v754_v19 = vld [vmem:[%s1477_s7 + $0xa8] sm:$0xff]  ;;  %v300_v22 = vld [vmem:[%s1477_s7 + $0x38] sm:$0xff]  ;;  %v755_v24 = vld [vmem:[%s1477_s7 + $0xb0] sm:$0xff] }
  0x7a   : > { %982 = vmatprep.subr.bf16.mxu1 %v1303_v3  ;;  %v986_v20 = vpack.c.bf16 %v754_v19, %v753_v18  ;;  %v965_v23 = vpack.c.bf16 %v300_v22, %v299_v21  ;;  %v756_v25 = vld [vmem:[%s1477_s7 + $0xb8] sm:$0xff]  ;;  %v301_v27 = vld [vmem:[%s1477_s7 + $0x40] sm:$0xff]  ;;  %v302_v28 = vld [vmem:[%s1477_s7 + $0x48] sm:$0xff] }
  0x7b   : > { %v989_v26 = vpack.c.bf16 %v756_v25, %v755_v24  ;;  %v968_v29 = vpack.c.bf16 %v302_v28, %v301_v27  ;;  %v757_v30 = vld [vmem:[%s1477_s7 + $0xc0] sm:$0xff]  ;;  %v758_v31 = vld [vmem:[%s1477_s7 + $0xc8] sm:$0xff]  ;;  %v303_v33 = vld [vmem:[%s1477_s7 + $0x50] sm:$0xff] }
  0x7c   : > { %v992_v32 = vpack.c.bf16 %v758_v31, %v757_v30  ;;  %v304_v34 = vld [vmem:[%s1477_s7 + $0x58] sm:$0xff]  ;;  %v759_v36 = vld [vmem:[%s1477_s7 + $0xd0] sm:$0xff]  ;;  %v305_v39 = vld [vmem:[%s1477_s7 + $0x60] sm:$0xff] }
  0x7d   : > { %v971_v35 = vpack.c.bf16 %v304_v34, %v303_v33  ;;  %v760_v37 = vld [vmem:[%s1477_s7 + $0xd8] sm:$0xff]  ;;  %v306_v40 = vld [vmem:[%s1477_s7 + $0x68] sm:$0xff]  ;;  %v761_v42 = vld [vmem:[%s1477_s7 + $0xe0] sm:$0xff] }
  0x7e   : > { %v995_v38 = vpack.c.bf16 %v760_v37, %v759_v36  ;;  %v974_v41 = vpack.c.bf16 %v306_v40, %v305_v39  ;;  %v762_v43 = vld [vmem:[%s1477_s7 + $0xe8] sm:$0xff]  ;;  %v307_v45 = vld [vmem:[%s1477_s7 + $0x70] sm:$0xff]  ;;  %v308_v46 = vld [vmem:[%s1477_s7 + $0x78] sm:$0xff] }
  0x7f   : > { %v998_v44 = vpack.c.bf16 %v762_v43, %v761_v42  ;;  %v977_v47 = vpack.c.bf16 %v308_v46, %v307_v45  ;;  %v763_v48 = vld [vmem:[%s1477_s7 + $0xf0] sm:$0xff]  ;;  %v764_v49 = vld [vmem:[%s1477_s7 + $0xf8] sm:$0xff]  ;;  %v290_v51 = vld [vmem:[#allocation3] sm:$0xff] }
  0x80   : > { %960 = vmatpush3.bf16.xpose.msra.mxu0 %v959_v11  ;;  %v1001_v50 = vpack.c.bf16 %v764_v49, %v763_v48  ;;  %v291_v52 = vld [vmem:[#allocation3 + $0x8] sm:$0xff]  ;;  %v292_v53 = vld [vmem:[#allocation3 + $0x10] sm:$0xff]  ;;  %v513_v54 = vld [vmem:[%s1483_s25] sm:$0xff] }
  0x81   : > { %961 = vmatprep.subr.bf16.mxu0 %v1303_v3  ;;  %984 = vmatpush3.bf16.xpose.msra.mxu1 %v983_v14  ;;  %v514_v55 = vld [vmem:[%s1483_s25 + $0x8] sm:$0xff]  ;;  %v515_v57 = vld [vmem:[%s1483_s25 + $0x10] sm:$0xff]  ;;  %v516_v58 = vld [vmem:[%s1483_s25 + $0x18] sm:$0xff] }
  0x82   : > { %985 = vmatprep.subr.bf16.mxu1 %v1303_v3  ;;  %v1004_v56 = vpack.c.bf16 %v514_v55, %v513_v54  ;;  %v1007_v59 = vpack.c.bf16 %v516_v58, %v515_v57  ;;  %v517_v60 = vld [vmem:[%s1483_s25 + $0x20] sm:$0xff]  ;;  %v518_v61 = vld [vmem:[%s1483_s25 + $0x28] sm:$0xff]  ;;  %v519_v63 = vld [vmem:[%s1483_s25 + $0x30] sm:$0xff] }
  0x83   : > { %v1010_v62 = vpack.c.bf16 %v518_v61, %v517_v60  ;;  %v520_v0 = vld [vmem:[%s1483_s25 + $0x38] sm:$0xff]  ;;  %v521_v2 = vld [vmem:[%s1483_s25 + $0x40] sm:$0xff]  ;;  %v522_v4 = vld [vmem:[%s1483_s25 + $0x48] sm:$0xff] }
  0x84   : > { %v1013_v1 = vpack.c.bf16 %v520_v0, %v519_v63  ;;  %v1016_v5 = vpack.c.bf16 %v522_v4, %v521_v2  ;;  %v523_v7 = vld [vmem:[%s1483_s25 + $0x50] sm:$0xff]  ;;  %v524_v8 = vld [vmem:[%s1483_s25 + $0x58] sm:$0xff]  ;;  %v525_v10 = vld [vmem:[%s1483_s25 + $0x60] sm:$0xff] }
  0x85   : > { %v1019_v9 = vpack.c.bf16 %v524_v8, %v523_v7  ;;  %v526_v11 = vld [vmem:[%s1483_s25 + $0x68] sm:$0xff]  ;;  %v527_v13 = vld [vmem:[%s1483_s25 + $0x70] sm:$0xff]  ;;  %v528_v14 = vld [vmem:[%s1483_s25 + $0x78] sm:$0xff] }
  0x86   : > { %v1022_v12 = vpack.c.bf16 %v526_v11, %v525_v10  ;;  %v1025_v15 = vpack.c.bf16 %v528_v14, %v527_v13  ;;  %v510_v45 = vld [vmem:[#allocation2] sm:$0xff]  ;;  %v511_v49 = vld [vmem:[#allocation2 + $0x8] sm:$0xff] }
  0x88   : > { %963 = vmatpush3.bf16.xpose.msra.mxu0 %v962_v17 }
  0x89   : > { %964 = vmatprep.subr.bf16.mxu0 %v1303_v3  ;;  %987 = vmatpush3.bf16.xpose.msra.mxu1 %v986_v20 }
  0x8a   : > { %988 = vmatprep.subr.bf16.mxu1 %v1303_v3 }
  0x90   : > { %966 = vmatpush3.bf16.xpose.msra.mxu0 %v965_v23 }
  0x91   : > { %967 = vmatprep.subr.bf16.mxu0 %v1303_v3  ;;  %990 = vmatpush3.bf16.xpose.msra.mxu1 %v989_v26 }
  0x92   : > { %991 = vmatprep.subr.bf16.mxu1 %v1303_v3 }
  0x98   : > { %969 = vmatpush3.bf16.xpose.msra.mxu0 %v968_v29 }
  0x99   : > { %970 = vmatprep.subr.bf16.mxu0 %v1303_v3  ;;  %993 = vmatpush3.bf16.xpose.msra.mxu1 %v992_v32 }
  0x9a   : > { %994 = vmatprep.subr.bf16.mxu1 %v1303_v3 }
  0xa0   : > { %972 = vmatpush3.bf16.xpose.msra.mxu0 %v971_v35 }
  0xa1   : > { %973 = vmatprep.subr.bf16.mxu0 %v1303_v3  ;;  %996 = vmatpush3.bf16.xpose.msra.mxu1 %v995_v38 }
  0xa2   : > { %997 = vmatprep.subr.bf16.mxu1 %v1303_v3 }
  0xa8   : > { %975 = vmatpush3.bf16.xpose.msra.mxu0 %v974_v41 }
  0xa9   : > { %976 = vmatprep.subr.bf16.mxu0 %v1303_v3  ;;  %999 = vmatpush3.bf16.xpose.msra.mxu1 %v998_v44 }
  0xaa   : > { %1000 = vmatprep.subr.bf16.mxu1 %v1303_v3 }
  0xb0   : > { %978 = vmatpush3.bf16.xpose.msra.mxu0 %v977_v47 }
  0xb1   : > { %1003 = vmatprep.subr.bf16.mxu0 %v1303_v3  ;;  %1002 = vmatpush3.bf16.xpose.msra.mxu1 %v1001_v50 }
  0xb2   : > { %1027 = vmatprep.subr.bf16.mxu1 %v1303_v3 }
  0xb7   : > { %865 = vmatmul.mubr.f32.vlgmr.msra.gmra.mrb[0].mxu0 %v290_v51 }
  0xb8   : > { %867 = vmatprep.mubr.msk.f32.mxu0 %vm1304_vm0, %v1305_v6  ;;  %906 = vmatmul.mubr.f32.vlgmr.msra.gmra.mrb[0].mxu1 %v290_v51 }
  0xb9   : > { %908 = vmatprep.mubr.msk.f32.mxu1 %vm1304_vm0, %v1305_v6  ;;  %1005 = vmatpush3.bf16.msra.mxu0 %v1004_v56 }
  0xba   : > { %1035 = vmatpush3.bf16.msra.mxu1 %v1004_v56  ;;  %1006 = vmatprep.subr.bf16.mxu0 %v1303_v3 }
  0xbb   : > { %868 = vmatmul.mubr.f32.gmra.mrb[2].mxu0 %v291_v52  ;;  %1028 = vmatprep.subr.bf16.mxu1 %v1303_v3 }
  0xbc   : > { %870 = vmatprep.mubr.msk.f32.mxu0 %vm1304_vm0, %v1305_v6  ;;  %909 = vmatmul.mubr.f32.gmra.mrb[2].mxu1 %v291_v52 }
  0xbd   : > { %911 = vmatprep.mubr.msk.f32.mxu1 %vm1304_vm0, %v1305_v6  ;;  %1008 = vmatpush3.bf16.msra.mxu0 %v1007_v59 }
  0xbe   : > { %1036 = vmatpush3.bf16.msra.mxu1 %v1007_v59  ;;  %1009 = vmatprep.subr.bf16.mxu0 %v1303_v3 }
  0xbf   : > { %871 = vmatmul.mubr.f32.gmra.mrb[4].mxu0 %v292_v53  ;;  %1029 = vmatprep.subr.bf16.mxu1 %v1303_v3 }
  0xc0   : > { %946 = vmatprep.mubr.msk.f32.mxu0 %vm1304_vm0, %v1305_v6  ;;  %912 = vmatmul.mubr.f32.gmra.mrb[4].mxu1 %v292_v53  ;;  %v512_v53 = vld [vmem:[#allocation2 + $0x10] sm:$0xff] }
  0xc1   : > { %949 = vmatprep.mubr.msk.f32.mxu1 %vm1304_vm0, %v1305_v6  ;;  %1011 = vmatpush3.bf16.msra.mxu0 %v1010_v62 }
  0xc2   : > { %1037 = vmatpush3.bf16.msra.mxu1 %v1010_v62  ;;  %1012 = vmatprep.subr.bf16.mxu0 %v1303_v3 }
  0xc3   : > { %1030 = vmatprep.subr.bf16.mxu1 %v1303_v3 }
  0xc5   : > { %1014 = vmatpush3.bf16.msra.mxu0 %v1013_v1 }
  0xc6   : > { %1038 = vmatpush3.bf16.msra.mxu1 %v1013_v1  ;;  %1015 = vmatprep.subr.bf16.mxu0 %v1303_v3 }
  0xc7   : > { %1031 = vmatprep.subr.bf16.mxu1 %v1303_v3 }
  0xc9   : > { %1017 = vmatpush3.bf16.msra.mxu0 %v1016_v5 }
  0xca   : > { %1039 = vmatpush3.bf16.msra.mxu1 %v1016_v5  ;;  %1018 = vmatprep.subr.bf16.mxu0 %v1303_v3 }
  0xcb   : > { %1032 = vmatprep.subr.bf16.mxu1 %v1303_v3 }
  0xcd   : > { %1020 = vmatpush3.bf16.msra.mxu0 %v1019_v9 }
  0xce   : > { %1040 = vmatpush3.bf16.msra.mxu1 %v1019_v9  ;;  %1021 = vmatprep.subr.bf16.mxu0 %v1303_v3 }
  0xcf   : > { %1033 = vmatprep.subr.bf16.mxu1 %v1303_v3 }
  0xd1   : > { %1023 = vmatpush3.bf16.msra.mxu0 %v1022_v12 }
  0xd2   : > { %1041 = vmatpush3.bf16.msra.mxu1 %v1022_v12  ;;  %1024 = vmatprep.subr.bf16.mxu0 %v1303_v3 }
  0xd3   : > { %1034 = vmatprep.subr.bf16.mxu1 %v1303_v3 }
  0xd5   : > { %1026 = vmatpush3.bf16.msra.mxu0 %v1025_v15 }
  0xd6   : > { %1042 = vmatpush3.bf16.msra.mxu1 %v1025_v15 }
 0x18a   : > { %v375_v16 = vpop.f32.mrb[0].mxu0 }
 0x18b   : > { %v765_v17 = vmul.f32 -1.442695, %v375_v16  ;;  %v866_v18 = vpop.f32.mrb[1].mxu0  ;;  %v472_v19 = vpop.f32.mrb[0].mxu1 }
 0x18c   : > { %v907_v21 = vpop.f32.mrb[1].mxu1 }
 0x18d   : > { %1136 = vpow2.f32 %v765_v17 }
 0x18e   : > { %v380_v20 = vpop.f32.mrb[2].mxu0 }
 0x18f   : > { %v766_v22 = vmul.f32 -1.442695, %v380_v20  ;;  %v869_v23 = vpop.f32.mrb[3].mxu0  ;;  %v477_v24 = vpop.f32.mrb[2].mxu1 }
 0x190   : > { %v910_v26 = vpop.f32.mrb[3].mxu1 }
 0x191   : > { %1138 = vpow2.f32 %v766_v22 }
 0x192   : > { %v385_v25 = vpop.f32.mrb[4].mxu0 }
 0x193   : > { %v767_v27 = vmul.f32 -1.442695, %v385_v25  ;;  %v872_v28 = vpop.f32.mrb[5].mxu0  ;;  %v482_v3 = vpop.f32.mrb[4].mxu1 }
 0x194   : > { %v913_v29 = vpop.f32.mrb[5].mxu1 }
 0x195   : > { %1140 = vpow2.f32 %v767_v27 }
 0x197   : > { %v1137_v30 = vpop.eup %1136 }
 0x198   : > { %v495_v31 = vadd.f32 1.0, %v1137_v30 }
 0x19a   : > { %1142 = vrcp.f32 %v495_v31 }
 0x19b   : > { %v1139_v32 = vpop.eup %1138 }
 0x19c   : > { %v496_v33 = vadd.f32 1.0, %v1139_v32 }
 0x19e   : > { %1144 = vrcp.f32 %v496_v33 }
 0x19f   : > { %v1141_v34 = vpop.eup %1140 }
 0x1a0   : > { %v497_v35 = vadd.f32 1.0, %v1141_v34 }
 0x1a2   : > { %1146 = vrcp.f32 %v497_v35 }
 0x1a4   : > { %v1143_v36 = vpop.eup %1142 }
 0x1a5   : > { %v504_v37 = vmul.f32 %v1143_v36, %v375_v16 }
 0x1a7   : > { %v507_v38 = vmul.f32 %v504_v37, %v472_v19 }
 0x1a8   : > { %v1145_v39 = vpop.eup %1144 }
 0x1a9   : > { %v505_v40 = vmul.f32 %v1145_v39, %v380_v20  ;;  %947 = vmatmul.mubr.f32.vlgmr.msra.gmra.mrb[6].mxu0 %v507_v38 }
 0x1ab   : > { %v508_v41 = vmul.f32 %v505_v40, %v477_v24 }
 0x1ac   : > { %v1147_v42 = vpop.eup %1146 }
 0x1ad   : > { %v506_v43 = vmul.f32 %v1147_v42, %v385_v25  ;;  %950 = vmatmul.mubr.f32.vlgmr.msra.gmra.mrb[6].mxu1 %v508_v41 }
 0x1ae   : > { %952 = vmatprep.mubr.msk.f32.mxu1 %vm1304_vm0, %v1305_v6 }
 0x1af   : > { %v509_v44 = vmul.f32 %v506_v43, %v482_v3 }
 0x1b1   : > { %953 = vmatmul.mubr.f32.gmra.mrb[8].mxu1 %v509_v44 }
 0x27c   : > { %v595_v46 = vpop.f32.mrb[6].mxu0 }
 0x27d   : > { %v609_v47 = vadd.f32 %v595_v46, %v510_v45  ;;  %v948_v48 = vpop.f32.mrb[7].mxu0 }
 0x27f   : > { %612 = vst [vmem:[#allocation2] sm:$0xff] %v609_v47 }
 0x280   : > { %v600_v50 = vpop.f32.mrb[6].mxu1 }
 0x281   : > { %v610_v51 = vadd.f32 %v600_v50, %v511_v49  ;;  %v951_v52 = vpop.f32.mrb[7].mxu1  ;;  %618 = sbr.rel (%p768_p4) target bundleno = 656 (0x290), region = 52 }
 0x283   : > { %613 = vst [vmem:[#allocation2 + $0x8] sm:$0xff] %v610_v51 }
 0x284   : > { %v605_v54 = vpop.f32.mrb[8].mxu1 }
 0x285   : > { %v611_v55 = vadd.f32 %v605_v54, %v512_v53  ;;  %v954_v56 = vpop.f32.mrb[9].mxu1 }
 0x286   : > { %v619_v6 = vld [vmem:[#allocation2] sm:$0xff] (!%p768_p4) }
 0x287   : > { %614 = vst [vmem:[#allocation2 + $0x10] sm:$0xff] %v611_v55  ;;  %622 = vst [vmem:[#allocation9] sm:$0xff] (!%p768_p4), %v619_v6 }
 0x28a   : > { %v620_v57 = vld [vmem:[#allocation2 + $0x8] sm:$0xff] }
 0x28b   : > { %623 = vst [vmem:[#allocation9 + $0x8] sm:$0xff] %v620_v57 }
 0x28e   : > { %v621_v58 = vld [vmem:[#allocation2 + $0x10] sm:$0xff] }
 0x28f   : > { %624 = vst [vmem:[#allocation9 + $0x10] sm:$0xff] %v621_v58 }
 0x290 PF: > { %p1068_p6 = scmp.eq.s32.totalorder %s1358_s18, 1  ;;  %s1306_s23 = smov [#allocation9]  }
 0x291   : > { %s634_s4 = sshll.u32 %s1306_s23, 4  ;;  %s635_s4 = int_to_ptr.vmem [resolvable:$true] %s634_s4 }
 0x292   : > { %s1204_s11 = scalar_lea.vmem %s635_s4, 384  ;;  %p1211_p13 = scmp.lt.s32.totalorder %s635_s4, %s635_s4 }
 0x293   : > { %p1205_p7 = scmp.ne.s32.totalorder %s635_s4, %s1204_s11  ;;  %p1212_p5 = scmp.lt.s32.totalorder %s1204_s11, %s1204_s11 }
 0x295   : > { %p1206_p9 = pnand %p1205_p7, %p1068_p6  ;;  %p1213_p8 = por %p1212_p5, %p1211_p13 }
 0x297   : > { %p1207_p11 = pneg %p1206_p9 }
 0x299   : > { %p1214_p12 = pnand %p1213_p8, %p1207_p11 }
 0x29b   : > { %1217 = shalt.err (!%p1214_p12)
}
 0x29c   : > { %s1218_s20 = scalar_lea.hbm %s1629_s3, 384 }
 0x29d   : > { %p1219_p10 = scmp.ne.s32.totalorder %s1629_s3, %s1218_s20  ;;  %p1224_p3 = scmp.lt.u32.totalorder %s1218_s20, %s1629_s3 }
 0x29f   : > { %p1220_p0 = pnand %p1219_p10, %p1068_p6 }
 0x2a1   : > { %p1221_p1 = pneg %p1220_p0 }
 0x2a3   : > { %p1226_p2 = pnand %p1224_p3, %p1221_p1 }
 0x2a5   : > { %1229 = shalt.err (!%p1226_p2)
}
 0x2a6   : > { %s1307_s6 = smov 128   ;;  %s1308_s9 = smov 8  }
 0x2a7   : > { %1059 = dma.vmem_to_hbm [thread:$0]  (%p1068_p6), %s635_s4, 384, %s1629_s3, [#allocation5], %s1307_s6, %s1307_s6, %s1308_s9  }
 0x2a8   : > { %1263 = dma.done.wait (%p1068_p6), [#allocation5], 384  }
 0x2a9   : > { %1265 = vsyncadd (%p1068_p6), [#allocation5], 4294966912 }
 0x2aa PF: > { %s18_s17 = sadd.s32 1, %s1288_s17   ;;  %s1643_s12 = smov %s1272_s13 }
 0x2ab   : > { %p15_p4 = scmp.ge.s32.totalorder %s18_s17, 4   ;;  %s1644_s13 = smov %s1276_s14 }
 0x2ac   : > { %s1645_s14 = smov %s1384_s24  ;;  %s1646_s15 = smov %s1284_s16 }
 0x2ad   : > { %s1647_s16 = smov %s1649_s19  ;;  %17 = sbr.rel (!%p15_p4) target bundleno = 6 (0x6), region = 101 }
 0x2b4   :  { %650 = vsyncpa [#allocation4], 1 }
 0x2b5   :  { %652 = vsyncpa [#allocation4 + $0x1], 1 }
 0x2b6   :  { %653 = vsyncpa [#allocation7], 1 }
 0x2b7   :  { %655 = vsyncpa [#allocation7 + $0x1], 1 }
 0x2b8   :  { %656 = vsyncpa [#allocation5], 1 }
 0x2b9   :  { %658 = vsyncpa [#allocation5 + $0x1], 1 }

</bundles_post_ra>
